<compile_context>
chip_gen: v6e
topology: v6e:2x2x1
jax: 0.10.0
libtpu: 0.0.40
codegen_flags: <defaults>
</compile_context>

<pallas_src>
import functools
import math

import jax
import jax.numpy as jnp
from jax.experimental import pallas as pl
from jax.experimental.pallas import tpu as pltpu


def _rel_pos_rows_kernel(rows_ref, out_ref, *, seq, tq, tv, align):
    """Copies one lane-dense (tq, tv*D) output block out of the rows table.

    rows_ref : (2*seq - tv, tv*D) resident in VMEM (constant index_map).
    out_ref  : (tq, tv*D) output block for grid point (i, j).
    """
    i = pl.program_id(0)
    j = pl.program_id(1)
    # Row-table index of this block's first q row (derivation in the wrapper).
    # Always a multiple of gcd(tq, tv) since seq % tq == 0 and seq % tv == 0.
    t0 = seq + i * tq - (j + 1) * tv
    t0 = pl.multiple_of(t0, align)
    out_ref[...] = rows_ref[pl.ds(t0, tq), :]


def _vmem_capacity_bytes():
    """Per-core VMEM capacity; conservative fallback (v7x) if query fails."""
    try:
        return int(pltpu.get_tpu_info().vmem_capacity_bytes)
    except Exception:
        return 64 << 20


def _divisors(n):
    return [d for d in range(1, n + 1) if n % d == 0]


def _pick_tiles(seq, D, itemsize, pack, vmem_budget):
    """Auto tile selection: small tv (rows table scales with it), big tq."""
    divs = _divisors(seq)

    # tv: smallest divisor of seq that is pack-aligned and lane-dense
    # (tv*D % 128 == 0), with a per-row writeback chunk >= 2 KiB.
    tv_cands = [d for d in divs
                if d == seq or (d % pack == 0 and (d * D) % 128 == 0)]
    tv = None
    for d in sorted(tv_cands):
        if d * D * itemsize >= 2048:
            tv = d
            break
    if tv is None:
        tv = max(tv_cands)

    rows_bytes = (2 * seq - tv) * tv * D * itemsize

    def vmem_est(tq):
        blk = tq * tv * D * itemsize
        # Worst case: double-buffered rows (fallback path) + double-buffered out.
        return 2 * rows_bytes + 2 * blk + (1 << 20)

    # tq: largest divisor of seq (pack-aligned or == seq) that fits the budget.
    tq_cands = [d for d in divs if d == seq or d % pack == 0]
    feasible = [d for d in tq_cands if vmem_est(d) <= vmem_budget]
    if not feasible:
        feasible = [min(tq_cands)]
    tq = max(feasible)

    # Megacore balance (v7x, 2 TCs): if the total step count is odd (> 1),
    # prefer a smaller tq that makes it even, as long as blocks stay >= 1 MiB.
    def steps(t):
        return (seq // t) * (seq // tv)

    if steps(tq) > 1 and steps(tq) % 2 == 1:
        balanced = [d for d in feasible
                    if steps(d) % 2 == 0 and d * tv * D * itemsize >= (1 << 20)]
        if balanced:
            tq = max(balanced)
    return tq, tv


def relative_position_embedding(inputs, emb_table, *, input_dim, output_dim,
                                tq=None, tv=None):
    """JAX wrapper mirroring RelativePositionEmbedding.forward.

    inputs    : (batch, seq, hidden) -- only seq (axis 1) is used, like torch.
    emb_table : (input_dim, output_dim).
    Returns (seq, seq, output_dim) in emb_table.dtype.
    """
    seq = inputs.shape[1]
    D = output_dim
    assert emb_table.shape == (input_dim, output_dim)

    itemsize = jnp.dtype(emb_table.dtype).itemsize
    pack = max(8, 32 // itemsize)        # sublane packing: 8 f32 / 16 bf16 / 32 int8

    vmem_cap = _vmem_capacity_bytes()
    vmem_budget = int(vmem_cap * 0.85)

    auto_tq, auto_tv = _pick_tiles(seq, D, itemsize, pack, vmem_budget)
    if tv is None:
        tv = auto_tv
    if tq is None:
        tq = auto_tq
    tq = min(tq, seq)
    tv = min(tv, seq)

    assert seq % tq == 0 and seq % tv == 0, "tile sizes must divide seq"
    assert tq == seq or tq % pack == 0, \
        "tq must be a multiple of the sublane packing factor (or == seq)"
    assert tv == seq or (tv * D) % 128 == 0, \
        "tv*output_dim must be a multiple of 128 (or tv == seq) for lane-dense blocks"

    max_position = (input_dim - 1) // 2

    # --- tiny host/XLA-side precompute (O(seq * tv * D), << output size) -----
    # strip_rev[k] = emb[clamp((seq-1) - k, -mp, mp) + mp], k in [0, 2*seq-2].
    rel_rev = (seq - 1) - jnp.arange(2 * seq - 1, dtype=jnp.int32)
    ids_rev = jnp.clip(rel_rev, -max_position, max_position) + max_position
    strip_rev = emb_table[ids_rev]                        # (2*seq-1, D) tiny gather

    # Lane-dense rows table built from tv STATIC shifted slices (no gather HLO):
    #   rows[t, l, :] = strip_rev[tv-1-l+t] = strip[C - t + l],  C = 2*seq-1-tv.
    # Then output block (i, j), local row ql, column chunk vl, is exactly
    #   rows[seq + i*tq - (j+1)*tv + ql, vl]  ==  strip[(v - q) + (seq-1)].
    L = 2 * seq - tv
    if tv <= 128:
        cols = [strip_rev[tv - 1 - l: tv - 1 - l + L] for l in range(tv)]
        rows = jnp.stack(cols, axis=1)                    # (L, tv, D)
    else:
        # Gather fallback only for pathological (large-tv) tilings.
        t_idx = jnp.arange(L, dtype=jnp.int32)[:, None]
        l_idx = jnp.arange(tv, dtype=jnp.int32)[None, :]
        rows = strip_rev[tv - 1 - l_idx + t_idx]
    rows = rows.reshape(L, tv * D)                        # lane-dense

    # --- VMEM budget / compiler params ---------------------------------------
    rows_bytes = L * tv * D * itemsize
    blk_bytes = tq * tv * D * itemsize
    out_bytes = seq * seq * D * itemsize
    vmem_est = 2 * rows_bytes + 2 * blk_bytes + (1 << 20)     # worst case + slack
    # Always set the scoped-VMEM limit (v5e default is only 16 MiB), capped
    # chip-aware at ~90% of physical VMEM (v7x has 64 MiB per TensorCore).
    vmem_limit = int(min(max(vmem_est, 16 << 20), int(vmem_cap * 0.9)))

    cparams = dict(dimension_semantics=("parallel", "parallel"),
                   vmem_limit_bytes=vmem_limit)
    cost = pl.CostEstimate(flops=0, transcendentals=0,
                           bytes_accessed=out_bytes + rows_bytes)

    kernel = functools.partial(
        _rel_pos_rows_kernel, seq=seq, tq=tq, tv=tv, align=math.gcd(tq, tv))

    def make_call(rows_pipeline_mode):
        rows_spec_kwargs = {}
        if rows_pipeline_mode is not None:
            rows_spec_kwargs["pipeline_mode"] = rows_pipeline_mode
        return pl.pallas_call(
            kernel,
            out_shape=jax.ShapeDtypeStruct((seq, seq * D), emb_table.dtype),
            grid_spec=pltpu.PrefetchScalarGridSpec(
                num_scalar_prefetch=0,
                grid=(seq // tq, seq // tv),
                in_specs=[
                    # Full rows table resident in VMEM (constant index_map =>
                    # DMA'd once, not re-fetched per grid step).
                    pl.BlockSpec((L, tv * D), lambda i, j: (0, 0),
                                 **rows_spec_kwargs),
                ],
                out_specs=pl.BlockSpec((tq, tv * D), lambda i, j: (i, j)),
            ),
            compiler_params=pltpu.CompilerParams(**cparams),
            cost_estimate=cost,
        )

    try:
        # Constant index_map => a single buffer suffices; halves rows VMEM.
        out2d = make_call(pl.Buffered(1))(rows)
    except Exception:
        # Fallback if this JAX build rejects single-buffer pipeline_mode.
        out2d = make_call(None)(rows)

    # Free reshape back to the module's (seq, seq, output_dim) layout.
    return out2d.reshape(seq, seq, D)


if __name__ == "__main__":
    key = jax.random.PRNGKey(0)

    # Small shapes consistent with the module's forward.
    batch, seq, hidden = 2, 16, 32
    input_dim = 15          # => max_position = 7
    output_dim = 32

    k_in, k_emb = jax.random.split(key)
    inputs = jax.random.normal(k_in, (batch, seq, hidden), dtype=jnp.float32)

    # The module's default initializer is 'zeros'; use deterministic non-zero
    # values here so the lookup path is actually exercised.
    emb_table = jax.random.normal(k_emb, (input_dim, output_dim),
                                  dtype=jnp.float32) * 0.02

    out = relative_position_embedding(
        inputs, emb_table, input_dim=input_dim, output_dim=output_dim)
    out = jax.block_until_ready(out)

    # Pure-JAX reference of the torch forward.
    max_position = (input_dim - 1) // 2
    q_idxs = jnp.arange(seq, dtype=jnp.int32)[:, None]
    v_idxs = jnp.arange(seq, dtype=jnp.int32)[None, :]
    pos_ids = jnp.clip(v_idxs - q_idxs, -max_position, max_position) + max_position
    ref = emb_table[pos_ids]

    assert out.shape == (seq, seq, output_dim)
    assert jnp.array_equal(out, ref), "mismatch vs reference"

    print("KERNEL_OK")
</pallas_src>

<mosaic_0001>
module attributes {stable_mosaic.version = 11 : i64} {
  func.func @_rel_pos_rows_kernel(%arg0: i32, %arg1: i32, %arg2: memref<16x512xf32, #tpu.memory_space<vmem>>, %arg3: memref<16x512xf32, #tpu.memory_space<vmem>>) attributes {dimension_semantics = [#tpu.dimension_semantics<parallel>, #tpu.dimension_semantics<parallel>], iteration_bounds = array<i64: 1, 1>, scalar_prefetch = 0 : i64, scratch_operands = 0 : i64, tpu.core_type = #tpu.core_type<tc>, window_params = [{pipeline_mode = #tpu.pipeline_mode<synchronous>, transform_indices = @transform_0, window_bounds = array<i64: 16, 512>}, {transform_indices = @transform_1, window_bounds = array<i64: 16, 512>}]} {
    %c16_i32 = arith.constant 16 : i32
    %0 = arith.muli %arg0, %c16_i32 : i32
    %c16_i32_0 = arith.constant 16 : i32
    %1 = arith.addi %c16_i32_0, %0 : i32
    %c1_i32 = arith.constant 1 : i32
    %2 = arith.addi %arg1, %c1_i32 : i32
    %c16_i32_1 = arith.constant 16 : i32
    %3 = arith.muli %2, %c16_i32_1 : i32
    %4 = arith.subi %1, %3 : i32
    %5 = tpu.assume_multiple %4, 16 : i32
    %6 = arith.index_cast %5 : i32 to index
    %c0 = arith.constant 0 : index
    %7 = vector.load %arg2[%6, %c0] : memref<16x512xf32, #tpu.memory_space<vmem>>, vector<16x512xf32>
    %c0_2 = arith.constant 0 : index
    %c0_3 = arith.constant 0 : index
    %8 = vector.load %arg3[%c0_2, %c0_3] : memref<16x512xf32, #tpu.memory_space<vmem>>, vector<16x512xf32>
    tpu.vector_store %arg3[%c0_2, %c0_3], %7 {strides = array<i32>} : memref<16x512xf32, #tpu.memory_space<vmem>>, vector<16x512xf32>,
    return
  }
  func.func @transform_0(%arg0: i32, %arg1: i32) -> (i32, i32) {
    %c0_i32 = arith.constant 0 : i32
    %c0_i32_0 = arith.constant 0 : i32
    %c0_i32_1 = arith.constant 0 : i32
    return %c0_i32, %c0_i32_0 : i32, i32
  }
  func.func @transform_1(%arg0: i32, %arg1: i32) -> (i32, i32) {
    %c0_i32 = arith.constant 0 : i32
    return %arg0, %arg1 : i32, i32
  }
}

module attributes {stable_mosaic.version = 11 : i64} {
  func.func @_rel_pos_rows_kernel(%arg0: i32, %arg1: i32, %arg2: memref<16x512xf32, #tpu.memory_space<vmem>>, %arg3: memref<16x512xf32, #tpu.memory_space<vmem>>) attributes {dimension_semantics = [#tpu.dimension_semantics<parallel>, #tpu.dimension_semantics<parallel>], iteration_bounds = array<i64: 1, 1>, scalar_prefetch = 0 : i64, scratch_operands = 0 : i64, tpu.core_type = #tpu.core_type<tc>, window_params = [{pipeline_mode = #tpu.pipeline_mode<synchronous>, transform_indices = @transform_0, window_bounds = array<i64: 16, 512>}, {transform_indices = @transform_1, window_bounds = array<i64: 16, 512>}]} {
    %c16_i32 = arith.constant 16 : i32
    %0 = arith.muli %arg0, %c16_i32 : i32
    %c16_i32_0 = arith.constant 16 : i32
    %1 = arith.addi %c16_i32_0, %0 : i32
    %c1_i32 = arith.constant 1 : i32
    %2 = arith.addi %arg1, %c1_i32 : i32
    %c16_i32_1 = arith.constant 16 : i32
    %3 = arith.muli %2, %c16_i32_1 : i32
    %4 = arith.subi %1, %3 : i32
    %5 = tpu.assume_multiple %4, 16 : i32
    %6 = arith.index_cast %5 : i32 to index
    %c0 = arith.constant 0 : index
    %7 = vector.load %arg2[%6, %c0] : memref<16x512xf32, #tpu.memory_space<vmem>>, vector<16x512xf32>
    %c0_2 = arith.constant 0 : index
    %c0_3 = arith.constant 0 : index
    %8 = vector.load %arg3[%c0_2, %c0_3] : memref<16x512xf32, #tpu.memory_space<vmem>>, vector<16x512xf32>
    tpu.vector_store %arg3[%c0_2, %c0_3], %7 {strides = array<i32>} : memref<16x512xf32, #tpu.memory_space<vmem>>, vector<16x512xf32>,
    return
  }
  func.func @transform_0(%arg0: i32, %arg1: i32) -> (i32, i32) {
    %c0_i32 = arith.constant 0 : i32
    %c0_i32_0 = arith.constant 0 : i32
    %c0_i32_1 = arith.constant 0 : i32
    return %c0_i32, %c0_i32_0 : i32, i32
  }
  func.func @transform_1(%arg0: i32, %arg1: i32) -> (i32, i32) {
    %c0_i32 = arith.constant 0 : i32
    return %arg0, %arg1 : i32, i32
  }
}

</mosaic_0001>

<bundles_post_ra>
// kernel: tpu_custom_call.1
= control target key start
LH: loop header
LB: loop body
LE: loop exit
PB: predicated region body
PF: predicated region fallthrough
CT: control target
= control target key end

     0   :  { %6 = vsyncpa [#allocation3], 0  ;;  %s142_s0 = inlined_call_operand.hbm [shape: f32[16,512], index: 0, kind: input, shape index: {}]   ;;  %s143_s1 = inlined_call_operand.hbm [shape: f32[16,512], index: 1, kind: output, shape index: {}]  }
   0x1   :  { %7 = vsyncpa [#allocation4], 0  ;;  %s116_s6 = smov [#allocation2]  }
   0x2   :  { %s13_s7 = sshll.u32 %s116_s6, 4  ;;  %s14_s7 = int_to_ptr.vmem [resolvable:$true] %s13_s7 }
   0x3   :  { %s80_s8 = scalar_lea.vmem %s14_s7, 1024  ;;  %p85_p1 = scmp.lt.s32.totalorder %s14_s7, %s14_s7 }
   0x4   :  { %p81_p0 = scmp.ne.s32.totalorder %s14_s7, %s80_s8  ;;  %p86_p2 = scmp.lt.s32.totalorder %s80_s8, %s80_s8 }
   0x6   :  { %p87_p3 = por %p86_p2, %p85_p1 }
   0x8   :  { %p88_p4 = pnand %p87_p3, %p81_p0 }
   0xa   :  { %91 = shalt.err (!%p88_p4)
}
   0xb   :  { %s117_s9 = smov 512   ;;  %s118_s10 = smov 32  }
   0xc   :  { %19 = dma.hbm_to_vmem [thread:$0]  %s142_s0, 1024, %s14_s7, [#allocation3], %s117_s9, %s117_s9, %s118_s10  }
   0xd   :  { %112 = dma.done.wait [#allocation3], 1024  }
   0xe   :  { %113 = vsyncadd [#allocation3], 4294966272  ;;  %s119_s13 = smov [#allocation5]   ;;  %v33_v0 = vld [vmem:[#allocation2] sm:$0xff]  ;;  %v34_v1 = vld [vmem:[#allocation2 + $0x8] sm:$0xff] }
   0xf   :  { %s54_s14 = sshll.u32 %s119_s13, 4  ;;  %v35_v2 = vld [vmem:[#allocation2 + $0x10] sm:$0xff]  ;;  %41 = vst [vmem:[#allocation5] sm:$0xff] %v33_v0  ;;  %42 = vst [vmem:[#allocation5 + $0x8] sm:$0xff] %v34_v1  ;;  %v36_v3 = vld [vmem:[#allocation2 + $0x18] sm:$0xff]  ;;  %s55_s14 = int_to_ptr.vmem [resolvable:$true] %s54_s14 }
  0x10   :  { %43 = vst [vmem:[#allocation5 + $0x10] sm:$0xff] %v35_v2  ;;  %v37_v4 = vld [vmem:[#allocation2 + $0x20] sm:$0xff]  ;;  %v38_v5 = vld [vmem:[#allocation2 + $0x28] sm:$0xff]  ;;  %44 = vst [vmem:[#allocation5 + $0x18] sm:$0xff] %v36_v3  ;;  %s92_s0 = scalar_lea.vmem %s55_s14, 1024  ;;  %p97_p6 = scmp.lt.s32.totalorder %s55_s14, %s55_s14 }
  0x11   :  { %45 = vst [vmem:[#allocation5 + $0x20] sm:$0xff] %v37_v4  ;;  %46 = vst [vmem:[#allocation5 + $0x28] sm:$0xff] %v38_v5  ;;  %v39_v6 = vld [vmem:[#allocation2 + $0x30] sm:$0xff]  ;;  %v40_v7 = vld [vmem:[#allocation2 + $0x38] sm:$0xff]  ;;  %p93_p5 = scmp.ne.s32.totalorder %s55_s14, %s92_s0  ;;  %p98_p7 = scmp.lt.s32.totalorder %s92_s0, %s92_s0 }
  0x12   :  { %47 = vst [vmem:[#allocation5 + $0x30] sm:$0xff] %v39_v6  ;;  %48 = vst [vmem:[#allocation5 + $0x38] sm:$0xff] %v40_v7 }
  0x13   :  { %p99_p8 = por %p98_p7, %p97_p6 }
  0x15   :  { %p100_p9 = pnand %p99_p8, %p93_p5 }
  0x17   :  { %103 = shalt.err (!%p100_p9)
}
  0x18   :  { %60 = dma.vmem_to_hbm [thread:$0]  %s55_s14, 1024, %s143_s1, [#allocation4], %s117_s9, %s117_s9, %s118_s10  }
  0x19   :  { %114 = dma.done.wait [#allocation4], 1024  }
  0x1a   :  { %115 = vsyncadd [#allocation4], 4294966272 }
  0x1b   :  { %64 = vsyncpa [#allocation3], 1 }
  0x1c   :  { %65 = vsyncpa [#allocation4], 1 }

// kernel: tpu_custom_call.1
= control target key start
LH: loop header
LB: loop body
LE: loop exit
PB: predicated region body
PF: predicated region fallthrough
CT: control target
= control target key end

     0   :  { %6 = vsyncpa [#allocation3], 0  ;;  %s142_s0 = inlined_call_operand.hbm [shape: f32[16,512], index: 0, kind: input, shape index: {}]   ;;  %s143_s1 = inlined_call_operand.hbm [shape: f32[16,512], index: 1, kind: output, shape index: {}]  }
   0x1   :  { %7 = vsyncpa [#allocation4], 0  ;;  %s116_s6 = smov [#allocation2]  }
   0x2   :  { %s13_s7 = sshll.u32 %s116_s6, 4  ;;  %s14_s7 = int_to_ptr.vmem [resolvable:$true] %s13_s7 }
   0x3   :  { %s80_s8 = scalar_lea.vmem %s14_s7, 1024  ;;  %p85_p1 = scmp.lt.s32.totalorder %s14_s7, %s14_s7 }
   0x4   :  { %p81_p0 = scmp.ne.s32.totalorder %s14_s7, %s80_s8  ;;  %p86_p2 = scmp.lt.s32.totalorder %s80_s8, %s80_s8 }
   0x6   :  { %p87_p3 = por %p86_p2, %p85_p1 }
   0x8   :  { %p88_p4 = pnand %p87_p3, %p81_p0 }
   0xa   :  { %91 = shalt.err (!%p88_p4)
}
   0xb   :  { %s117_s9 = smov 512   ;;  %s118_s10 = smov 32  }
   0xc   :  { %19 = dma.hbm_to_vmem [thread:$0]  %s142_s0, 1024, %s14_s7, [#allocation3], %s117_s9, %s117_s9, %s118_s10  }
   0xd   :  { %112 = dma.done.wait [#allocation3], 1024  }
   0xe   :  { %113 = vsyncadd [#allocation3], 4294966272  ;;  %s119_s13 = smov [#allocation5]   ;;  %v33_v0 = vld [vmem:[#allocation2] sm:$0xff]  ;;  %v34_v1 = vld [vmem:[#allocation2 + $0x8] sm:$0xff] }
   0xf   :  { %s54_s14 = sshll.u32 %s119_s13, 4  ;;  %v35_v2 = vld [vmem:[#allocation2 + $0x10] sm:$0xff]  ;;  %41 = vst [vmem:[#allocation5] sm:$0xff] %v33_v0  ;;  %42 = vst [vmem:[#allocation5 + $0x8] sm:$0xff] %v34_v1  ;;  %v36_v3 = vld [vmem:[#allocation2 + $0x18] sm:$0xff]  ;;  %s55_s14 = int_to_ptr.vmem [resolvable:$true] %s54_s14 }
  0x10   :  { %43 = vst [vmem:[#allocation5 + $0x10] sm:$0xff] %v35_v2  ;;  %v37_v4 = vld [vmem:[#allocation2 + $0x20] sm:$0xff]  ;;  %v38_v5 = vld [vmem:[#allocation2 + $0x28] sm:$0xff]  ;;  %44 = vst [vmem:[#allocation5 + $0x18] sm:$0xff] %v36_v3  ;;  %s92_s0 = scalar_lea.vmem %s55_s14, 1024  ;;  %p97_p6 = scmp.lt.s32.totalorder %s55_s14, %s55_s14 }
  0x11   :  { %45 = vst [vmem:[#allocation5 + $0x20] sm:$0xff] %v37_v4  ;;  %46 = vst [vmem:[#allocation5 + $0x28] sm:$0xff] %v38_v5  ;;  %v39_v6 = vld [vmem:[#allocation2 + $0x30] sm:$0xff]  ;;  %v40_v7 = vld [vmem:[#allocation2 + $0x38] sm:$0xff]  ;;  %p93_p5 = scmp.ne.s32.totalorder %s55_s14, %s92_s0  ;;  %p98_p7 = scmp.lt.s32.totalorder %s92_s0, %s92_s0 }
  0x12   :  { %47 = vst [vmem:[#allocation5 + $0x30] sm:$0xff] %v39_v6  ;;  %48 = vst [vmem:[#allocation5 + $0x38] sm:$0xff] %v40_v7 }
  0x13   :  { %p99_p8 = por %p98_p7, %p97_p6 }
  0x15   :  { %p100_p9 = pnand %p99_p8, %p93_p5 }
  0x17   :  { %103 = shalt.err (!%p100_p9)
}
  0x18   :  { %60 = dma.vmem_to_hbm [thread:$0]  %s55_s14, 1024, %s143_s1, [#allocation4], %s117_s9, %s117_s9, %s118_s10  }
  0x19   :  { %114 = dma.done.wait [#allocation4], 1024  }
  0x1a   :  { %115 = vsyncadd [#allocation4], 4294966272 }
  0x1b   :  { %64 = vsyncpa [#allocation3], 1 }
  0x1c   :  { %65 = vsyncpa [#allocation4], 1 }

</bundles_post_ra>
